<compile_context>
chip_gen: v7x
topology: tpu7x:2x2x1
jax: 0.10.0
libtpu: 0.0.40
codegen_flags: <defaults>
</compile_context>

<pallas_src>
import functools

import jax
import jax.numpy as jnp
from jax.experimental import pallas as pl
from jax.experimental.pallas import tpu as pltpu

LANE = 128  # TPU lane width; last dims padded to a multiple of this.


def _round_up(x, m):
    return (x + m - 1) // m * m


def _fc_kernel(x_ref, wt_ref, b_ref, o_ref):
    # x_ref:  (B, K)    flattened activations (K=512, lane-aligned)
    # wt_ref: (K, Np)   weight, pre-transposed + padded to Np=128 lanes
    # b_ref:  (1, Np)   bias, padded to Np
    # o_ref:  (B, Np)   padded logits (lane-dense full-width stores)
    acc = jnp.dot(x_ref[...], wt_ref[...], preferred_element_type=jnp.float32)
    o_ref[...] = (acc + b_ref[...]).astype(o_ref.dtype)


def prepare_fc_params(weight, bias):
    """One-time (init-time) parameter prep — OUTSIDE the per-call hot path.

    weight: (N, K) as in nn.Linear; bias: (N,)
    Returns wt_padded (K, Np) and b_padded (1, Np) with Np = round_up(N, 128),
    zero-padded so padded logit columns are exactly 0*x + 0 and can be sliced off.
    """
    n, k = weight.shape
    n_pad = _round_up(n, LANE)
    wt_padded = jnp.zeros((k, n_pad), weight.dtype).at[:, :n].set(weight.T)
    b_padded = jnp.zeros((1, n_pad), bias.dtype).at[:, :n].set(bias.reshape(1, n))
    return wt_padded, b_padded


def frontendv2_forward(x_nchw, wt_padded, b_padded, num_classes):
    """x_nchw: (B, C, H, W); wt_padded: (K, Np); b_padded: (1, Np)."""
    B = x_nchw.shape[0]
    K, Np = wt_padded.shape

    # nn.Flatten: (B, C, H, W) -> (B, C*H*W), row-major (matches PyTorch NCHW).
    x_flat = x_nchw.reshape(B, K)

    bytes_f32 = 4
    cost = pl.CostEstimate(
        flops=2 * B * K * Np,
        transcendentals=0,
        bytes_accessed=(x_flat.size + wt_padded.size + b_padded.size + B * Np) * bytes_f32,
    )

    # Tiny problem (~0.4 MiB double-buffered): map whole arrays into VMEM, no grid.
    out_padded = pl.pallas_call(
        _fc_kernel,
        out_shape=jax.ShapeDtypeStruct((B, Np), x_flat.dtype),
        in_specs=[
            pl.BlockSpec(memory_space=pltpu.MemorySpace.VMEM),  # x    (B, K)
            pl.BlockSpec(memory_space=pltpu.MemorySpace.VMEM),  # W^T  (K, Np)
            pl.BlockSpec(memory_space=pltpu.MemorySpace.VMEM),  # bias (1, Np)
        ],
        out_specs=pl.BlockSpec(memory_space=pltpu.MemorySpace.VMEM),
        cost_estimate=cost,
    )(x_flat, wt_padded, b_padded)

    # Slice padded logits back to the real class count.
    return out_padded[:, :num_classes]


if __name__ == "__main__":
    num_classes = 100
    B, C, H, W = 2, 512, 1, 1  # Frontendv2: Linear(512 * 1 * 1, num_classes)

    key = jax.random.PRNGKey(0)
    kx, kw, kb = jax.random.split(key, 3)

    # Deterministic synthetic parameters (same shapes as nn.Linear(512, 100)).
    x = jax.random.normal(kx, (B, C, H, W), dtype=jnp.float32)
    weight = jax.random.normal(kw, (num_classes, C * H * W), dtype=jnp.float32) * 0.02
    bias = jax.random.normal(kb, (num_classes,), dtype=jnp.float32) * 0.02

    # One-time weight prep (transpose + lane-pad) — not part of the per-call path.
    wt_padded, b_padded = jax.block_until_ready(prepare_fc_params(weight, bias))

    fwd = jax.jit(functools.partial(frontendv2_forward, num_classes=num_classes))
    out = jax.block_until_ready(fwd(x, wt_padded, b_padded))

    # Pure-JAX reference check of the forward semantics.
    ref = x.reshape(B, -1) @ weight.T + bias
    assert out.shape == (B, num_classes)
    assert jnp.allclose(out, ref, atol=1e-4, rtol=1e-4)

    print("KERNEL_OK")
</pallas_src>

<mosaic_0001>
module attributes {stable_mosaic.version = 11 : i64} {
  func.func @_fc_kernel(%arg0: memref<2x512xf32, #tpu.memory_space<vmem>>, %arg1: memref<512x128xf32, #tpu.memory_space<vmem>>, %arg2: memref<1x128xf32, #tpu.memory_space<vmem>>, %arg3: memref<2x128xf32, #tpu.memory_space<vmem>>) attributes {dimension_semantics = [], scalar_prefetch = 0 : i64, scratch_operands = 0 : i64, tpu.core_type = #tpu.core_type<tc>} {
    %c0 = arith.constant 0 : index
    %c0_0 = arith.constant 0 : index
    %0 = vector.load %arg0[%c0, %c0_0] : memref<2x512xf32, #tpu.memory_space<vmem>>, vector<2x512xf32>
    %c0_1 = arith.constant 0 : index
    %c0_2 = arith.constant 0 : index
    %1 = vector.load %arg1[%c0_1, %c0_2] : memref<512x128xf32, #tpu.memory_space<vmem>>, vector<512x128xf32>
    %cst = arith.constant dense<0.000000e+00> : vector<2x128xf32>
    %2 = tpu.matmul %0, %1, %cst {dimension_numbers = #tpu.dot_dimension_numbers<[1], [0], [0], [1], [0, 0, 1, 1], [], []>} : vector<2x512xf32>, vector<512x128xf32>, vector<2x128xf32> -> vector<2x128xf32>
    %c0_3 = arith.constant 0 : index
    %c0_4 = arith.constant 0 : index
    %3 = vector.load %arg2[%c0_3, %c0_4] : memref<1x128xf32, #tpu.memory_space<vmem>>, vector<1x128xf32>
    %4 = vector.broadcast %3 : vector<1x128xf32> to vector<2x128xf32>
    %5 = arith.addf %2, %4 : vector<2x128xf32>
    %c0_5 = arith.constant 0 : index
    %c0_6 = arith.constant 0 : index
    %6 = vector.load %arg3[%c0_5, %c0_6] : memref<2x128xf32, #tpu.memory_space<vmem>>, vector<2x128xf32>
    tpu.vector_store %arg3[%c0_5, %c0_6], %5 {strides = array<i32>} : memref<2x128xf32, #tpu.memory_space<vmem>>, vector<2x128xf32>,
    return
  }
}

</mosaic_0001>

<bundles_post_ra>
// kernel: frontendv2_forward.1
= control target key start
LH: loop header
LB: loop body
LE: loop exit
PB: predicated region body
PF: predicated region fallthrough
CT: control target
= control target key end

     0   :  { %8 = vsyncpa [#allocation3], 0  ;;  %s523_s0 = inlined_call_operand.vmem [shape: f32[2,512], index: 0, kind: input, shape index: {}]   ;;  %s524_s1 = inlined_call_operand.hbm [shape: f32[512,128], index: 1, kind: input, shape index: {}]   ;;  %s525_s2 = inlined_call_operand.vmem [shape: f32[1,128], index: 2, kind: input, shape index: {}]   ;;  %s526_s3 = inlined_call_operand.hbm [shape: f32[2,128], index: 3, kind: output, shape index: {}]  }
   0x1   :  { %9 = vsyncpa [#allocation4], 0  ;;  %s468_s12 = smov [#allocation2]   ;;  %s420_s16 = scalar_lea.hbm %s524_s1, 8192 }
   0x2   :  { %s17_s13 = sshll.u32 %s468_s12, 4  ;;  %p421_p0 = scmp.ne.s32.totalorder %s524_s1, %s420_s16  ;;  %s18_s13 = int_to_ptr.vmem [resolvable:$true] %s17_s13 }
   0x3   :  { %p424_p1 = scmp.lt.u32.totalorder %s420_s16, %s524_s1 }
   0x5   :  { %p426_p2 = pnand %p424_p1, %p421_p0 }
   0x7   :  { %429 = shalt.err (!%p426_p2)
}
   0x8   :  { %s430_s21 = scalar_lea.vmem %s18_s13, 8192  ;;  %p435_p4 = scmp.lt.s32.totalorder %s18_s13, %s18_s13 }
   0x9   :  { %p431_p3 = scmp.ne.s32.totalorder %s18_s13, %s430_s21  ;;  %p436_p5 = scmp.lt.s32.totalorder %s430_s21, %s430_s21 }
   0xb   :  { %p437_p6 = por %p436_p5, %p435_p4 }
   0xd   :  { %p438_p7 = pnand %p437_p6, %p431_p3 }
   0xf   :  { %441 = shalt.err (!%p438_p7)
}
  0x10   :  { %s469_s22 = smov 128   ;;  %s470_s23 = smov 8  }
  0x11   :  { %23 = dma.hbm_to_vmem [thread:$0]  %s524_s1, 8192, %s18_s13, [#allocation3], %s469_s22, %s469_s22, %s470_s23  }
  0x12   :  { %464 = dma.done.wait [#allocation3], 8192  }
  0x13   :  { %465 = vsyncadd [#allocation3], 4294959104  ;;  %v46_v0 = vld [vmem:[#allocation2 + $0x80] sm:$0xff]  ;;  %v47_v1 = vld [vmem:[#allocation2 + $0x88] sm:$0xff]  ;;  %v471_v47 = vmov 1983009808   ;;  %v106_v49 = vlaneseq }
  0x14   :  { %v30_v2 = vld [vmem:[#allocation2] sm:$0xff]  ;;  %v350_v3 = vpack.c.bf16 %v47_v1, %v46_v0  ;;  %v31_v4 = vld [vmem:[#allocation2 + $0x8] sm:$0xff]  ;;  %v48_v11 = vld [vmem:[#allocation2 + $0x90] sm:$0xff]  ;;  %v104_v48 = vunpack.c.l.s4 %v471_v47  ;;  %s472_s28 = smov [#allocation5]  }
  0x15   :  { %v78_v5 = vld [vmem:[#allocation2 + $0x180] sm:$0xff]  ;;  %v79_v6 = vld [vmem:[#allocation2 + $0x188] sm:$0xff]  ;;  %v352_v7 = vpack.c.bf16 %v31_v4, %v30_v2  ;;  %v49_v13 = vld [vmem:[#allocation2 + $0x98] sm:$0xff]  ;;  %v107_v0 = vshrl.u32 %v106_v49, 7  ;;  %s270_s29 = sshll.u32 %s472_s28, 4  ;;  %s271_s29 = int_to_ptr.vmem [resolvable:$true] %s270_s29 }
  0x16   :  { %v382_v8 = vpack.c.bf16 %v79_v6, %v78_v5  ;;  %v62_v9 = vld [vmem:[#allocation2 + $0x100] sm:$0xff]  ;;  %v63_v10 = vld [vmem:[#allocation2 + $0x108] sm:$0xff]  ;;  %351 = vmatprep.subr.bf16.mxu0 %v350_v3  ;;  %v32_v14 = vld [vmem:[#allocation2 + $0x10] sm:$0xff]  ;;  %v354_v16 = vpack.c.bf16 %v49_v13, %v48_v11  ;;  %v105_v63 = vunpack.c.0.s8 %v104_v48  ;;  %s442_s30 = scalar_lea.vmem %s271_s29, 32  ;;  %p447_p9 = scmp.lt.s32.totalorder %s271_s29, %s271_s29 }
  0x17   :  { %v384_v12 = vpack.c.bf16 %v63_v10, %v62_v9  ;;  %v33_v15 = vld [vmem:[#allocation2 + $0x18] sm:$0xff]  ;;  %353 = vmatpush3.bf16.msra.mxu0 %v352_v7  ;;  %v80_v18 = vld [vmem:[#allocation2 + $0x190] sm:$0xff]  ;;  %v50_v23 = vld [vmem:[#allocation2 + $0xa0] sm:$0xff]  ;;  %p443_p8 = scmp.ne.s32.totalorder %s271_s29, %s442_s30  ;;  %p448_p10 = scmp.lt.s32.totalorder %s442_s30, %s442_s30 }
  0x18   :  { %383 = vmatprep.subr.bf16.mxu1 %v382_v8  ;;  %v356_v17 = vpack.c.bf16 %v33_v15, %v32_v14  ;;  %v81_v19 = vld [vmem:[#allocation2 + $0x198] sm:$0xff]  ;;  %v64_v20 = vld [vmem:[#allocation2 + $0x110] sm:$0xff]  ;;  %v51_v24 = vld [vmem:[#allocation2 + $0xa8] sm:$0xff]  ;;  %355 = vmatprep.subr.bf16.mxu0 %v354_v16  ;;  %v108_v13 = vsub.s32 %v105_v63, %v107_v0 }
  0x19   :  { %385 = vmatpush3.bf16.msra.mxu1 %v384_v12  ;;  %v386_v21 = vpack.c.bf16 %v81_v19, %v80_v18  ;;  %v65_v22 = vld [vmem:[#allocation2 + $0x118] sm:$0xff]  ;;  %v358_v26 = vpack.c.bf16 %v51_v24, %v50_v23  ;;  %v34_v27 = vld [vmem:[#allocation2 + $0x20] sm:$0xff]  ;;  %v35_v28 = vld [vmem:[#allocation2 + $0x28] sm:$0xff]  ;;  %p449_p11 = por %p448_p10, %p447_p9 }
  0x1a   :  { %v388_v25 = vpack.c.bf16 %v65_v22, %v64_v20  ;;  %v82_v29 = vld [vmem:[#allocation2 + $0x1a0] sm:$0xff]  ;;  %v83_v30 = vld [vmem:[#allocation2 + $0x1a8] sm:$0xff]  ;;  %v360_v33 = vpack.c.bf16 %v35_v28, %v34_v27  ;;  %v52_v35 = vld [vmem:[#allocation2 + $0xb0] sm:$0xff] }
  0x1b   :  { %387 = vmatprep.subr.bf16.mxu1 %v386_v21  ;;  %v66_v31 = vld [vmem:[#allocation2 + $0x120] sm:$0xff]  ;;  %v67_v32 = vld [vmem:[#allocation2 + $0x128] sm:$0xff]  ;;  %357 = vmatpush3.bf16.msra.mxu0 %v356_v17  ;;  %v390_v34 = vpack.c.bf16 %v83_v30, %v82_v29  ;;  %v53_v36 = vld [vmem:[#allocation2 + $0xb8] sm:$0xff]  ;;  %p450_p12 = pnand %p449_p11, %p443_p8 }
  0x1c   :  { %v36_v37 = vld [vmem:[#allocation2 + $0x30] sm:$0xff]  ;;  %359 = vmatprep.subr.bf16.mxu0 %v358_v26  ;;  %v392_v38 = vpack.c.bf16 %v67_v32, %v66_v31  ;;  %v362_v39 = vpack.c.bf16 %v53_v36, %v52_v35  ;;  %v37_v40 = vld [vmem:[#allocation2 + $0x38] sm:$0xff]  ;;  %v54_v46 = vld [vmem:[#allocation2 + $0xc0] sm:$0xff] }
  0x1d   :  { %389 = vmatpush3.bf16.msra.mxu1 %v388_v25  ;;  %v84_v41 = vld [vmem:[#allocation2 + $0x1b0] sm:$0xff]  ;;  %v85_v42 = vld [vmem:[#allocation2 + $0x1b8] sm:$0xff]  ;;  %v55_v50 = vld [vmem:[#allocation2 + $0xc8] sm:$0xff]  ;;  %v364_v51 = vpack.c.bf16 %v37_v40, %v36_v37 }
  0x1e   :  { %391 = vmatprep.subr.bf16.mxu1 %v390_v34  ;;  %v394_v43 = vpack.c.bf16 %v85_v42, %v84_v41  ;;  %v68_v44 = vld [vmem:[#allocation2 + $0x130] sm:$0xff]  ;;  %v69_v45 = vld [vmem:[#allocation2 + $0x138] sm:$0xff]  ;;  %v86_v52 = vld [vmem:[#allocation2 + $0x1c0] sm:$0xff]  ;;  %v366_v55 = vpack.c.bf16 %v55_v50, %v54_v46 }
  0x1f   :  { %361 = vmatpush3.bf16.msra.mxu0 %v360_v33  ;;  %v87_v53 = vld [vmem:[#allocation2 + $0x1c8] sm:$0xff]  ;;  %v396_v54 = vpack.c.bf16 %v69_v45, %v68_v44  ;;  %v38_v56 = vld [vmem:[#allocation2 + $0x40] sm:$0xff]  ;;  %v56_v61 = vld [vmem:[#allocation2 + $0xd0] sm:$0xff] }
  0x20   :  { %363 = vmatprep.subr.bf16.mxu0 %v362_v39  ;;  %v39_v57 = vld [vmem:[#allocation2 + $0x48] sm:$0xff]  ;;  %v70_v58 = vld [vmem:[#allocation2 + $0x140] sm:$0xff]  ;;  %v398_v59 = vpack.c.bf16 %v87_v53, %v86_v52  ;;  %v57_v62 = vld [vmem:[#allocation2 + $0xd8] sm:$0xff] }
  0x21   :  { %393 = vmatpush3.bf16.msra.mxu1 %v392_v38  ;;  %v71_v60 = vld [vmem:[#allocation2 + $0x148] sm:$0xff]  ;;  %v88_v1 = vld [vmem:[#allocation2 + $0x1d0] sm:$0xff]  ;;  %v89_v2 = vld [vmem:[#allocation2 + $0x1d8] sm:$0xff]  ;;  %v368_v3 = vpack.c.bf16 %v39_v57, %v38_v56  ;;  %v370_v5 = vpack.c.bf16 %v57_v62, %v56_v61 }
  0x22   :  { %395 = vmatprep.subr.bf16.mxu1 %v394_v43  ;;  %v400_v4 = vpack.c.bf16 %v71_v60, %v70_v58  ;;  %v40_v6 = vld [vmem:[#allocation2 + $0x50] sm:$0xff]  ;;  %v41_v7 = vld [vmem:[#allocation2 + $0x58] sm:$0xff]  ;;  %v402_v9 = vpack.c.bf16 %v89_v2, %v88_v1  ;;  %v58_v11 = vld [vmem:[#allocation2 + $0xe0] sm:$0xff] }
  0x23   :  { %365 = vmatpush3.bf16.msra.mxu0 %v364_v51  ;;  %v72_v8 = vld [vmem:[#allocation2 + $0x150] sm:$0xff]  ;;  %v73_v10 = vld [vmem:[#allocation2 + $0x158] sm:$0xff]  ;;  %v59_v12 = vld [vmem:[#allocation2 + $0xe8] sm:$0xff]  ;;  %v372_v16 = vpack.c.bf16 %v41_v7, %v40_v6 }
  0x24   :  { %367 = vmatprep.subr.bf16.mxu0 %v366_v55  ;;  %v90_v14 = vld [vmem:[#allocation2 + $0x1e0] sm:$0xff]  ;;  %v91_v15 = vld [vmem:[#allocation2 + $0x1e8] sm:$0xff]  ;;  %v404_v18 = vpack.c.bf16 %v73_v10, %v72_v8  ;;  %v374_v19 = vpack.c.bf16 %v59_v12, %v58_v11  ;;  %v60_v25 = vld [vmem:[#allocation2 + $0xf0] sm:$0xff] }
  0x25   :  { %397 = vmatpush3.bf16.msra.mxu1 %v396_v54  ;;  %v42_v17 = vld [vmem:[#allocation2 + $0x60] sm:$0xff]  ;;  %v43_v20 = vld [vmem:[#allocation2 + $0x68] sm:$0xff]  ;;  %v406_v23 = vpack.c.bf16 %v91_v15, %v90_v14  ;;  %v61_v26 = vld [vmem:[#allocation2 + $0xf8] sm:$0xff] }
  0x26   :  { %399 = vmatprep.subr.bf16.mxu1 %v398_v59  ;;  %v74_v21 = vld [vmem:[#allocation2 + $0x160] sm:$0xff]  ;;  %v75_v24 = vld [vmem:[#allocation2 + $0x168] sm:$0xff]  ;;  %v92_v29 = vld [vmem:[#allocation2 + $0x1f0] sm:$0xff]  ;;  %v376_v31 = vpack.c.bf16 %v43_v20, %v42_v17  ;;  %v378_v35 = vpack.c.bf16 %v61_v26, %v60_v25 }
  0x27   :  { %369 = vmatpush3.bf16.msra.mxu0 %v368_v3  ;;  %v29_v22 = vld [vmem:[%s523_s0] sm:$0xff]  ;;  %v93_v30 = vld [vmem:[#allocation2 + $0x1f8] sm:$0xff]  ;;  %v408_v34 = vpack.c.bf16 %v75_v24, %v74_v21  ;;  %v44_v36 = vld [vmem:[#allocation2 + $0x70] sm:$0xff] }
  0x28   :  { %371 = vmatprep.subr.bf16.mxu0 %v370_v5  ;;  %v109_v27 = vrot.slane %v29_v22, %v108_v13  ;;  %v102_v28 = vcombine.high %v29_v22, %v29_v22  ;;  %v45_v37 = vld [vmem:[#allocation2 + $0x78] sm:$0xff]  ;;  %v410_v38 = vpack.c.bf16 %v93_v30, %v92_v29  ;;  %v76_v39 = vld [vmem:[#allocation2 + $0x170] sm:$0xff]  ;;  %v279_v45 = vld [vmem:[%s525_s2] ss:$0 sm:$0xff] }
  0x29   :  { %401 = vmatpush3.bf16.msra.mxu1 %v400_v4  ;;  %v77_v40 = vld [vmem:[#allocation2 + $0x178] sm:$0xff]  ;;  %v380_v42 = vpack.c.bf16 %v45_v37, %v44_v36 }
  0x2a   :  { %403 = vmatprep.subr.bf16.mxu1 %v402_v9  ;;  %v117_v32 = vcombine.high %v109_v27, %v109_v27  ;;  %v116_v33 = vrot.slane %v102_v28, %v108_v13  ;;  %v412_v43 = vpack.c.bf16 %v77_v40, %v76_v39 }
  0x2b   :  { %373 = vmatpush3.bf16.msra.mxu0 %v372_v16 }
  0x2c   :  { %375 = vmatprep.subr.bf16.mxu0 %v374_v19  ;;  %187 = vmatprep.mubr.f32.mxu0 %v117_v32  ;;  %v118_v41 = vcombine.high %v116_v33, %v116_v33 }
  0x2d   :  { %405 = vmatpush3.bf16.msra.mxu1 %v404_v18 }
  0x2e   :  { %407 = vmatprep.subr.bf16.mxu1 %v406_v23  ;;  %257 = vmatprep.mubr.f32.mxu1 %v118_v41 }
  0x2f   :  { %377 = vmatpush3.bf16.msra.mxu0 %v376_v31 }
  0x30   :  { %379 = vmatprep.subr.bf16.mxu0 %v378_v35 }
  0x31   :  { %409 = vmatpush3.bf16.msra.mxu1 %v408_v34 }
  0x32   :  { %411 = vmatprep.subr.bf16.mxu1 %v410_v38 }
  0x33   :  { %381 = vmatpush3.bf16.msra.mxu0 %v380_v42 }
  0x35   :  { %413 = vmatpush3.bf16.msra.mxu1 %v412_v43 }
  0x36   :  { %188 = vmatmul.mubr.f32.vlgmr.msra.gmra.mrb[0].mxu0 %v109_v27 }
  0x38   :  { %258 = vmatmul.mubr.f32.vlgmr.msra.gmra.mrb[0].mxu1 %v116_v33 }
 0x109   :  { %v312_v44 = vpop.f32.mrb[0].mxu0 }
 0x10a   :  { %v313_v46 = vpop.f32.mrb[1].mxu0 }
 0x10b   :  { %v347_v47 = vpop.f32.mrb[0].mxu1  ;;  %v314_v48 = vadd.f32 %v313_v46, %v312_v44 }
 0x10c   :  { %v348_v49 = vpop.f32.mrb[1].mxu1 }
 0x10d   :  { %v349_v50 = vadd.f32 %v348_v49, %v347_v47  ;;  %v190_v51 = vadd.f32 %v314_v48, %v279_v45 }
 0x10f   :  { %v260_v52 = vadd.f32 %v349_v50, %v190_v51 }
 0x111   :  { %263 = vst [vmem:[#allocation5] sm:$0x3] %v260_v52 }
 0x112   :  { %453 = shalt.err (!%p450_p12)
}
 0x113   :  { %s454_s5 = scalar_lea.hbm %s526_s3, 32 }
 0x114   :  { %p455_p13 = scmp.ne.s32.totalorder %s526_s3, %s454_s5  ;;  %p458_p0 = scmp.lt.u32.totalorder %s454_s5, %s526_s3 }
 0x116   :  { %p460_p1 = pnand %p458_p0, %p455_p13 }
 0x118   :  { %463 = shalt.err (!%p460_p1)
}
 0x119   :  { %273 = dma.vmem_to_hbm [thread:$0]  %s271_s29, 32, %s526_s3, [#allocation4]  }
 0x11a   :  { %466 = dma.done.wait [#allocation4], 32  }
 0x11b   :  { %467 = vsyncadd [#allocation4], 4294967264 }
 0x11c   :  { %277 = vsyncpa [#allocation3], 1 }
 0x11d   :  { %278 = vsyncpa [#allocation4], 1 }

</bundles_post_ra>
